<compile_context>
chip_gen: v7x
topology: tpu7x:2x2x1
jax: 0.10.0
libtpu: 0.0.40
codegen_flags: <defaults>
</compile_context>

<pallas_src>
import jax
import jax.numpy as jnp
from jax.experimental import pallas as pl
from jax.experimental.pallas import tpu as pltpu


def _hbm_copy_kernel(x_hbm_ref, o_hbm_ref, copy_sem):
    # One whole-array HBM -> HBM DMA.  No VMEM staging, no compute.
    cp = pltpu.make_async_copy(x_hbm_ref, o_hbm_ref, copy_sem)
    cp.start()
    cp.wait()


def nokv_cache_copy(c_kv: jax.Array) -> jax.Array:
    """Materialize a distinct copy of c_kv via a single HBM->HBM DMA."""
    nbytes = c_kv.size * c_kv.dtype.itemsize
    return pl.pallas_call(
        _hbm_copy_kernel,
        out_shape=jax.ShapeDtypeStruct(c_kv.shape, c_kv.dtype),
        in_specs=[pl.BlockSpec(memory_space=pl.ANY)],
        out_specs=pl.BlockSpec(memory_space=pl.ANY),
        scratch_shapes=[pltpu.SemaphoreType.DMA(())],
        cost_estimate=pl.CostEstimate(
            flops=0, transcendentals=0, bytes_accessed=2 * nbytes
        ),
    )(c_kv)


def nokv_cache_forward(c_kv: jax.Array, *, materialize: bool = False) -> jax.Array:
    """Identity pass-through.

    Default path moves zero bytes (the op is a pure identity and JAX arrays
    are immutable).  Set `materialize=True` only if a distinct HBM buffer is
    required; that path uses the Pallas HBM->HBM DMA kernel above.
    """
    if not materialize:
        return c_kv
    return nokv_cache_copy(c_kv)


class NoKVCache:
    """Mirrors the PyTorch module: identity forward + host-side offset counter."""

    def __init__(self) -> None:
        self.offset = 0

    def zero(self) -> None:
        self.offset = 0

    def __call__(self, c_kv: jax.Array, *, materialize: bool = False) -> jax.Array:
        # Host-side Python state, exactly like the nn.Module attribute.
        # TODO(synk): if a caller jits __call__, this counter will not update
        # per traced call (same limitation as tracing the PyTorch module).
        self.offset += c_kv.shape[1]
        return nokv_cache_forward(c_kv, materialize=materialize)


if __name__ == "__main__":
    # c_kv: [batch, seq, compressed kv dim] — small deterministic example.
    B, T, DKV = 2, 8, 32
    key = jax.random.PRNGKey(0)
    c_kv = jax.random.normal(key, (B, T, DKV), dtype=jnp.float32)

    cache = NoKVCache()

    # Common (zero-copy) path: exactly the PyTorch semantics, zero HBM traffic.
    out = jax.block_until_ready(cache(c_kv))
    assert out.shape == c_kv.shape and out.dtype == c_kv.dtype
    assert cache.offset == T
    assert jnp.array_equal(out, c_kv), "identity pass-through mismatch"

    # Materialized path: run the Pallas HBM->HBM DMA copy kernel once.
    out2 = jax.block_until_ready(cache(c_kv, materialize=True))
    assert cache.offset == 2 * T
    assert out2.shape == c_kv.shape and out2.dtype == c_kv.dtype
    assert jnp.array_equal(out2, c_kv), "DMA copy mismatch"

    # Also exercise an odd, non-(8,128)-friendly shape to confirm the DMA
    # path has no layout/fallback issues.
    odd = jax.random.normal(jax.random.PRNGKey(1), (3, 5, 7), dtype=jnp.bfloat16)
    odd_out = jax.block_until_ready(nokv_cache_copy(odd))
    assert jnp.array_equal(odd_out, odd)

    cache.zero()
    assert cache.offset == 0

    print("KERNEL_OK")
</pallas_src>

<mosaic_0001>
module attributes {stable_mosaic.version = 11 : i64} {
  func.func @_hbm_copy_kernel(%arg0: memref<2x8x32xf32, #tpu.memory_space<any>>, %arg1: memref<2x8x32xf32, #tpu.memory_space<any>>, %arg2: memref<!tpu.dma_semaphore, #tpu.memory_space<semaphore_mem>>) attributes {dimension_semantics = [], scalar_prefetch = 0 : i64, scratch_operands = 1 : i64, tpu.core_type = #tpu.core_type<tc>} {
    tpu.enqueue_dma source(%arg0 : memref<2x8x32xf32, #tpu.memory_space<any>>) target(%arg1 : memref<2x8x32xf32, #tpu.memory_space<any>>) target_semaphore(%arg2 : memref<!tpu.dma_semaphore, #tpu.memory_space<semaphore_mem>>)
    tpu.wait_dma2 semaphore(%arg2 : memref<!tpu.dma_semaphore, #tpu.memory_space<semaphore_mem>>) src(%arg0 : memref<2x8x32xf32, #tpu.memory_space<any>>) dst(%arg1 : memref<2x8x32xf32, #tpu.memory_space<any>>)
    return
  }
}

</mosaic_0001>

<bundles_post_ra>
// kernel: tpu_custom_call.1
= control target key start
LH: loop header
LB: loop body
LE: loop exit
PB: predicated region body
PF: predicated region fallthrough
CT: control target
= control target key end

     0   :  { %s35_s6 = smov [#allocation2]   ;;  %s36_s7 = smov [#allocation3]   ;;  %s54_s0 = inlined_call_operand.hbm [shape: f32[2,8,32], index: 0, kind: input, shape index: {}]   ;;  %s55_s1 = inlined_call_operand.hbm [shape: f32[2,8,32], index: 1, kind: output, shape index: {}]  }
   0x1   :  { %s37_s8 = smov 0  }
   0x2   :  { %18 = dma.general %s54_s0, 256, %s55_s1, %s35_s6, %s36_s7, [#allocation4], %s37_s8, 0  }
   0x3   :  { %33 = dma.done.wait [#allocation2], 256 }
   0x4   :  { %34 = vsyncadd [#allocation2], 4294967040 }
   0x5   :  { %23 = vsyncmov [#allocation2] }
   0x8   :  { %s24_s13 = vpop.sfrf %23 }
   0x9   :  { %p29_p0 = scmp.ne.s32.totalorder %s24_s13, 0 }
   0xb   :  { %28 = shalt.err (%p29_p0)  }

</bundles_post_ra>
